<compile_context>
chip_gen: v7x
topology: tpu7x:2x2x1
jax: 0.10.0
libtpu: 0.0.40
codegen_flags: <defaults>
</compile_context>

<pallas_src>
import jax
import jax.numpy as jnp
from jax.experimental import pallas as pl
from jax.experimental.pallas import tpu as pltpu

_LANES = 128
_SUBLANES = 8
_MAX_BLOCK_ROWS = 2048  # (2048, 128) f32 = 1 MiB per input per pipeline buffer


def _event_rmse_kernel(pred_ref, true_ref, mask_ref, out_ref, num_acc, den_acc):
    step = pl.program_id(0)

    @pl.when(step == 0)
    def _init():
        num_acc[...] = jnp.zeros_like(num_acc)
        den_acc[...] = jnp.zeros_like(den_acc)

    pred = pred_ref[...]
    true = true_ref[...]
    m = mask_ref[...]

    # sqrt((t - p)**2) == |t - p| elementwise.
    masked_err = jnp.abs(true - pred) * m

    br = masked_err.shape[0]
    # VPU-only partial reduce: collapse block rows onto an (8, 128) vreg-shaped
    # accumulator; the cross-lane (XLU) reduce happens once, at the very end.
    num_acc[...] += jnp.sum(
        masked_err.reshape(br // _SUBLANES, _SUBLANES, _LANES), axis=0
    )
    den_acc[...] += jnp.sum(m.reshape(br // _SUBLANES, _SUBLANES, _LANES), axis=0)

    @pl.when(step == pl.num_programs(0) - 1)
    def _finalize():
        num = jnp.sum(num_acc[...])
        den = jnp.sum(den_acc[...])
        out_ref[0, 0] = num / den  # den == 0 -> NaN, same as the PyTorch reference


def _to_slab(x, rows):
    """Flatten, zero-pad, reshape an array into a lane-dense (rows, 128) f32 slab."""
    flat = x.astype(jnp.float32).reshape(-1)
    total = rows * _LANES
    flat = jnp.pad(flat, (0, total - flat.shape[0]))
    return flat.reshape(rows, _LANES)


def event_regression_loss_rmse(y_pred, y_true, mask, *, max_block_rows=_MAX_BLOCK_ROWS):
    """Pallas wrapper reproducing EventRegressionLossRMSE.forward."""
    assert max_block_rows % _SUBLANES == 0

    # Glue (plain JAX): only the first two columns are used, matching
    # y_true[:, :2] / mask[:, :2] in the PyTorch module.
    y_true2 = y_true[:, :2]
    mask2 = mask[:, :2]

    n = y_pred.shape[0] * 2
    rows = pl.cdiv(n, _LANES)
    rows = pl.cdiv(rows, _SUBLANES) * _SUBLANES
    block_rows = min(max_block_rows, rows)
    rows = pl.cdiv(rows, block_rows) * block_rows
    grid = (rows // block_rows,)

    pred_s = _to_slab(y_pred, rows)
    true_s = _to_slab(y_true2, rows)
    mask_s = _to_slab(mask2, rows)

    block_spec = pl.BlockSpec((block_rows, _LANES), lambda i: (i, 0))

    out = pl.pallas_call(
        _event_rmse_kernel,
        out_shape=jax.ShapeDtypeStruct((1, 1), jnp.float32),
        grid=grid,
        in_specs=[block_spec, block_spec, block_spec],
        out_specs=pl.BlockSpec(memory_space=pltpu.MemorySpace.SMEM),
        scratch_shapes=[
            pltpu.VMEM((_SUBLANES, _LANES), jnp.float32),
            pltpu.VMEM((_SUBLANES, _LANES), jnp.float32),
        ],
        compiler_params=pltpu.CompilerParams(
            dimension_semantics=("arbitrary",),
        ),
    )(pred_s, true_s, mask_s)
    return out[0, 0]


def _reference(y_pred, y_true, mask):
    return jnp.sum(jnp.abs(y_true[:, :2] - y_pred) * mask[:, :2]) / jnp.sum(mask[:, :2])


if __name__ == "__main__":
    key = jax.random.PRNGKey(0)

    # Test 1: tiny batch (single grid step).
    k1, k2, k3, key = jax.random.split(key, 4)
    B, C = 8, 4
    y_pred = jax.random.normal(k1, (B, 2), dtype=jnp.float32)
    y_true = jax.random.normal(k2, (B, C), dtype=jnp.float32)
    mask = (jax.random.uniform(k3, (B, C)) > 0.3).astype(jnp.float32)

    loss = jax.block_until_ready(event_regression_loss_rmse(y_pred, y_true, mask))
    ref = _reference(y_pred, y_true, mask)
    assert jnp.allclose(loss, ref, rtol=1e-5, atol=1e-6), (loss, ref)

    # Test 2: larger batch with a small block size to exercise the multi-step
    # grid / accumulator path.
    k1, k2, k3, key = jax.random.split(key, 4)
    B2, C2 = 600, 4
    y_pred2 = jax.random.normal(k1, (B2, 2), dtype=jnp.float32)
    y_true2 = jax.random.normal(k2, (B2, C2), dtype=jnp.float32)
    mask2 = (jax.random.uniform(k3, (B2, C2)) > 0.3).astype(jnp.float32)

    loss2 = jax.block_until_ready(
        event_regression_loss_rmse(y_pred2, y_true2, mask2, max_block_rows=8)
    )
    ref2 = _reference(y_pred2, y_true2, mask2)
    assert jnp.allclose(loss2, ref2, rtol=1e-5, atol=1e-6), (loss2, ref2)

    print("KERNEL_OK")
</pallas_src>

<mosaic_0001>
module attributes {stable_mosaic.version = 11 : i64} {
  func.func @_event_rmse_kernel(%arg0: i32, %arg1: memref<8x128xf32, #tpu.memory_space<vmem>>, %arg2: memref<8x128xf32, #tpu.memory_space<vmem>>, %arg3: memref<8x128xf32, #tpu.memory_space<vmem>>, %arg4: memref<1x1xf32, #tpu.memory_space<smem>>, %arg5: memref<8x128xf32, #tpu.memory_space<vmem>>, %arg6: memref<8x128xf32, #tpu.memory_space<vmem>>) attributes {dimension_semantics = [#tpu.dimension_semantics<arbitrary>], iteration_bounds = array<i64: 1>, scalar_prefetch = 0 : i64, scratch_operands = 2 : i64, tpu.core_type = #tpu.core_type<tc>, window_params = [{transform_indices = @transform_0, window_bounds = array<i64: 8, 128>}, {transform_indices = @transform_1, window_bounds = array<i64: 8, 128>}, {transform_indices = @transform_2, window_bounds = array<i64: 8, 128>}, {transform_indices = @transform_3, window_bounds = array<i64: 1, 1>}]} {
    %c0_i32 = arith.constant 0 : i32
    %0 = arith.cmpi eq, %arg0, %c0_i32 : i32
    %1 = arith.extui %0 : i1 to i32
    %c0_i32_0 = arith.constant 0 : i32
    %2 = arith.cmpi ne, %1, %c0_i32_0 : i32
    scf.if %2 {
      %cst_17 = arith.constant 0.000000e+00 : f32
      %22 = vector.broadcast %cst_17 : f32 to vector<8x128xf32>
      %c0_18 = arith.constant 0 : index
      %c0_19 = arith.constant 0 : index
      %23 = vector.load %arg5[%c0_18, %c0_19] : memref<8x128xf32, #tpu.memory_space<vmem>>, vector<8x128xf32>
      tpu.vector_store %arg5[%c0_18, %c0_19], %22 {strides = array<i32>} : memref<8x128xf32, #tpu.memory_space<vmem>>, vector<8x128xf32>,
      %cst_20 = arith.constant 0.000000e+00 : f32
      %24 = vector.broadcast %cst_20 : f32 to vector<8x128xf32>
      %c0_21 = arith.constant 0 : index
      %c0_22 = arith.constant 0 : index
      %25 = vector.load %arg6[%c0_21, %c0_22] : memref<8x128xf32, #tpu.memory_space<vmem>>, vector<8x128xf32>
      tpu.vector_store %arg6[%c0_21, %c0_22], %24 {strides = array<i32>} : memref<8x128xf32, #tpu.memory_space<vmem>>, vector<8x128xf32>,
    } else {
    }
    %c0 = arith.constant 0 : index
    %c0_1 = arith.constant 0 : index
    %3 = vector.load %arg1[%c0, %c0_1] : memref<8x128xf32, #tpu.memory_space<vmem>>, vector<8x128xf32>
    %c0_2 = arith.constant 0 : index
    %c0_3 = arith.constant 0 : index
    %4 = vector.load %arg2[%c0_2, %c0_3] : memref<8x128xf32, #tpu.memory_space<vmem>>, vector<8x128xf32>
    %c0_4 = arith.constant 0 : index
    %c0_5 = arith.constant 0 : index
    %5 = vector.load %arg3[%c0_4, %c0_5] : memref<8x128xf32, #tpu.memory_space<vmem>>, vector<8x128xf32>
    %6 = arith.subf %4, %3 : vector<8x128xf32>
    %7 = math.absf %6 : vector<8x128xf32>
    %8 = arith.mulf %7, %5 : vector<8x128xf32>
    %c0_6 = arith.constant 0 : index
    %c0_7 = arith.constant 0 : index
    %9 = vector.load %arg5[%c0_6, %c0_7] : memref<8x128xf32, #tpu.memory_space<vmem>>, vector<8x128xf32>
    %10 = vector.shape_cast %8 : vector<8x128xf32> to vector<1x8x128xf32>
    %cst = arith.constant dense<0.000000e+00> : vector<8x128xf32>
    %11 = vector.multi_reduction <add>, %10, %cst [0] : vector<1x8x128xf32> to vector<8x128xf32>
    %12 = arith.addf %9, %11 : vector<8x128xf32>
    %c0_8 = arith.constant 0 : index
    %c0_9 = arith.constant 0 : index
    %13 = vector.load %arg5[%c0_8, %c0_9] : memref<8x128xf32, #tpu.memory_space<vmem>>, vector<8x128xf32>
    tpu.vector_store %arg5[%c0_8, %c0_9], %12 {strides = array<i32>} : memref<8x128xf32, #tpu.memory_space<vmem>>, vector<8x128xf32>,
    %c0_10 = arith.constant 0 : index
    %c0_11 = arith.constant 0 : index
    %14 = vector.load %arg6[%c0_10, %c0_11] : memref<8x128xf32, #tpu.memory_space<vmem>>, vector<8x128xf32>
    %15 = vector.shape_cast %5 : vector<8x128xf32> to vector<1x8x128xf32>
    %cst_12 = arith.constant dense<0.000000e+00> : vector<8x128xf32>
    %16 = vector.multi_reduction <add>, %15, %cst_12 [0] : vector<1x8x128xf32> to vector<8x128xf32>
    %17 = arith.addf %14, %16 : vector<8x128xf32>
    %c0_13 = arith.constant 0 : index
    %c0_14 = arith.constant 0 : index
    %18 = vector.load %arg6[%c0_13, %c0_14] : memref<8x128xf32, #tpu.memory_space<vmem>>, vector<8x128xf32>
    tpu.vector_store %arg6[%c0_13, %c0_14], %17 {strides = array<i32>} : memref<8x128xf32, #tpu.memory_space<vmem>>, vector<8x128xf32>,
    %c0_i32_15 = arith.constant 0 : i32
    %19 = arith.cmpi eq, %arg0, %c0_i32_15 : i32
    %20 = arith.extui %19 : i1 to i32
    %c0_i32_16 = arith.constant 0 : i32
    %21 = arith.cmpi ne, %20, %c0_i32_16 : i32
    scf.if %21 {
      %c0_17 = arith.constant 0 : index
      %c0_18 = arith.constant 0 : index
      %22 = vector.load %arg5[%c0_17, %c0_18] : memref<8x128xf32, #tpu.memory_space<vmem>>, vector<8x128xf32>
      %23 = vector.shape_cast %22 : vector<8x128xf32> to vector<1x8x128xf32>
      %cst_19 = arith.constant dense<0.000000e+00> : vector<1xf32>
      %24 = vector.multi_reduction <add>, %23, %cst_19 [1, 2] : vector<1x8x128xf32> to vector<1xf32>
      %25 = vector.shape_cast %24 : vector<1xf32> to vector<1x1x1xf32>
      %26 = vector.extract %25[0, 0, 0] : f32 from vector<1x1x1xf32>
      %c0_20 = arith.constant 0 : index
      %c0_21 = arith.constant 0 : index
      %27 = vector.load %arg6[%c0_20, %c0_21] : memref<8x128xf32, #tpu.memory_space<vmem>>, vector<8x128xf32>
      %28 = vector.shape_cast %27 : vector<8x128xf32> to vector<1x8x128xf32>
      %cst_22 = arith.constant dense<0.000000e+00> : vector<1xf32>
      %29 = vector.multi_reduction <add>, %28, %cst_22 [1, 2] : vector<1x8x128xf32> to vector<1xf32>
      %30 = vector.shape_cast %29 : vector<1xf32> to vector<1x1x1xf32>
      %31 = vector.extract %30[0, 0, 0] : f32 from vector<1x1x1xf32>
      %32 = arith.divf %26, %31 : f32
      %c0_23 = arith.constant 0 : index
      %c0_24 = arith.constant 0 : index
      %33 = memref.load %arg4[%c0_23, %c0_24] : memref<1x1xf32, #tpu.memory_space<smem>>
      memref.store %32, %arg4[%c0_23, %c0_24] : memref<1x1xf32, #tpu.memory_space<smem>>
    } else {
    }
    return
  }
  func.func @transform_0(%arg0: i32) -> (i32, i32) {
    %c0_i32 = arith.constant 0 : i32
    %c0_i32_0 = arith.constant 0 : i32
    return %arg0, %c0_i32 : i32, i32
  }
  func.func @transform_1(%arg0: i32) -> (i32, i32) {
    %c0_i32 = arith.constant 0 : i32
    %c0_i32_0 = arith.constant 0 : i32
    return %arg0, %c0_i32 : i32, i32
  }
  func.func @transform_2(%arg0: i32) -> (i32, i32) {
    %c0_i32 = arith.constant 0 : i32
    %c0_i32_0 = arith.constant 0 : i32
    return %arg0, %c0_i32 : i32, i32
  }
  func.func @transform_3(%arg0: i32) -> (i32, i32) {
    %c0_i32 = arith.constant 0 : i32
    %c0_i32_0 = arith.constant 0 : i32
    %c0_i32_1 = arith.constant 0 : i32
    return %c0_i32, %c0_i32_0 : i32, i32
  }
}

</mosaic_0001>

<bundles_post_ra>
// kernel: tpu_custom_call.1
= control target key start
LH: loop header
LB: loop body
LE: loop exit
PB: predicated region body
PF: predicated region fallthrough
CT: control target
= control target key end

     0   :  { %8 = vsyncpa [#allocation5], 0  ;;  %s280_s0 = inlined_call_operand.hbm [shape: f32[8,128], index: 0, kind: input, shape index: {}]   ;;  %s281_s1 = inlined_call_operand.hbm [shape: f32[8,128], index: 1, kind: input, shape index: {}]   ;;  %s282_s2 = inlined_call_operand.hbm [shape: f32[8,128], index: 2, kind: input, shape index: {}]   ;;  %s283_s3 = inlined_call_operand.hbm [shape: f32[1,1], index: 3, kind: output, shape index: {}]  }
   0x1   :  { %9 = vsyncpa [#allocation8], 0 }
   0x2   :  { %10 = vsyncpa [#allocation6], 0  ;;  %s208_s12 = smov [#allocation7]   ;;  %s209_s14 = smov [#allocation4]  }
   0x3   :  { %s27_s13 = sshll.u32 %s208_s12, 4  ;;  %s17_s15 = sshll.u32 %s209_s14, 4  ;;  %s28_s13 = int_to_ptr.vmem [resolvable:$true] %s27_s13  ;;  %s18_s15 = int_to_ptr.vmem [resolvable:$true] %s17_s15 }
   0x4   :  { %s126_s18 = scalar_lea.hbm %s281_s1, 128 }
   0x5   :  { %p127_p0 = scmp.ne.s32.totalorder %s281_s1, %s126_s18  ;;  %p130_p1 = scmp.lt.u32.totalorder %s126_s18, %s281_s1 }
   0x7   :  { %p132_p2 = pnand %p130_p1, %p127_p0 }
   0x9   :  { %135 = shalt.err (!%p132_p2)
}
   0xa   :  { %s136_s23 = scalar_lea.vmem %s28_s13, 128  ;;  %p141_p4 = scmp.lt.s32.totalorder %s28_s13, %s28_s13 }
   0xb   :  { %p137_p3 = scmp.ne.s32.totalorder %s28_s13, %s136_s23  ;;  %p142_p5 = scmp.lt.s32.totalorder %s136_s23, %s136_s23 }
   0xd   :  { %p143_p6 = por %p142_p5, %p141_p4 }
   0xf   :  { %p144_p7 = pnand %p143_p6, %p137_p3 }
  0x11   :  { %147 = shalt.err (!%p144_p7)
}
  0x12   :  { %30 = dma.hbm_to_vmem [thread:$0]  %s281_s1, 128, %s28_s13, [#allocation8]  }
  0x13   :  { %s148_s28 = scalar_lea.hbm %s280_s0, 128 }
  0x14   :  { %p149_p8 = scmp.ne.s32.totalorder %s280_s0, %s148_s28  ;;  %p152_p9 = scmp.lt.u32.totalorder %s148_s28, %s280_s0 }
  0x16   :  { %p154_p10 = pnand %p152_p9, %p149_p8 }
  0x18   :  { %157 = shalt.err (!%p154_p10)
}
  0x19   :  { %s158_s6 = scalar_lea.vmem %s18_s15, 128  ;;  %p163_p12 = scmp.lt.s32.totalorder %s18_s15, %s18_s15 }
  0x1a   :  { %p159_p11 = scmp.ne.s32.totalorder %s18_s15, %s158_s6  ;;  %p164_p13 = scmp.lt.s32.totalorder %s158_s6, %s158_s6 }
  0x1c   :  { %p165_p0 = por %p164_p13, %p163_p12 }
  0x1e   :  { %p166_p1 = pnand %p165_p0, %p159_p11 }
  0x20   :  { %169 = shalt.err (!%p166_p1)
}
  0x21   :  { %20 = dma.hbm_to_vmem [thread:$0]  %s280_s0, 128, %s18_s15, [#allocation5]  }
  0x22   :  { %s210_s8 = smov [#allocation9]   ;;  %s170_s12 = scalar_lea.hbm %s282_s2, 128 }
  0x23   :  { %s37_s9 = sshll.u32 %s210_s8, 4  ;;  %p171_p2 = scmp.ne.s32.totalorder %s282_s2, %s170_s12  ;;  %s38_s9 = int_to_ptr.vmem [resolvable:$true] %s37_s9 }
  0x24   :  { %p174_p3 = scmp.lt.u32.totalorder %s170_s12, %s282_s2 }
  0x26   :  { %p176_p4 = pnand %p174_p3, %p171_p2 }
  0x28   :  { %179 = shalt.err (!%p176_p4)
}
  0x29   :  { %s180_s18 = scalar_lea.vmem %s38_s9, 128  ;;  %p185_p6 = scmp.lt.s32.totalorder %s38_s9, %s38_s9 }
  0x2a   :  { %p181_p5 = scmp.ne.s32.totalorder %s38_s9, %s180_s18  ;;  %p186_p7 = scmp.lt.s32.totalorder %s180_s18, %s180_s18 }
  0x2c   :  { %p187_p8 = por %p186_p7, %p185_p6 }
  0x2e   :  { %p188_p9 = pnand %p187_p8, %p181_p5 }
  0x30   :  { %191 = shalt.err (!%p188_p9)
}
  0x31   :  { %40 = dma.hbm_to_vmem [thread:$0]  %s282_s2, 128, %s38_s9, [#allocation8]  }
  0x32   :  { %202 = dma.done.wait [#allocation5], 128  }
  0x33   :  { %203 = vsyncadd [#allocation5], 4294967168 }
  0x34   :  { %204 = dma.done.wait [#allocation8], 256  }
  0x35   :  { %205 = vsyncadd [#allocation8], 4294967040  ;;  %v56_v0 = vld [vmem:[#allocation4] sm:$0xff]  ;;  %v57_v1 = vld [vmem:[#allocation7] sm:$0xff]  ;;  %s192_s24 = scalar_lea.hbm %s283_s3, 16 }
  0x36   :  { %v59_v2 = vsub.f32 %v57_v1, %v56_v0  ;;  %v58_v3 = vld [vmem:[#allocation9] sm:$0xff]  ;;  %p193_p10 = scmp.ne.s32.totalorder %s283_s3, %s192_s24  ;;  %p196_p11 = scmp.lt.u32.totalorder %s192_s24, %s283_s3 }
  0x38   :  { %v60_v4 = vand.u32 2147483647, %v59_v2  ;;  %p198_p12 = pnand %p196_p11, %p193_p10 }
  0x3a   :  { %v61_v5 = vmul.f32 %v60_v4, %v58_v3 }
  0x3c   :  { %74 = vadd.xlane.f32.xlu0 %v61_v5 }
  0x40   :  { %84 = vadd.xlane.f32.xlu0 %v58_v3 }
  0xc9   :  { %v75_v6 = vpop.xlane.xlu0 %74 }
  0xca   :  { %v76_v7 = vrot.slane %v75_v6, 4 }
  0xcc   :  { %v77_v8 = vadd.f32 %v76_v7, %v75_v6 }
  0xcd   :  { %v85_v9 = vpop.xlane.xlu0 %84 }
  0xce   :  { %v78_v10 = vrot.slane %v77_v8, 2  ;;  %v86_v11 = vrot.slane %v85_v9, 4 }
  0xd0   :  { %v87_v12 = vadd.f32 %v86_v11, %v85_v9  ;;  %v79_v13 = vadd.f32 %v78_v10, %v77_v8 }
  0xd2   :  { %v88_v14 = vrot.slane %v87_v12, 2  ;;  %v80_v15 = vrot.slane %v79_v13, 1 }
  0xd4   :  { %v89_v16 = vadd.f32 %v88_v14, %v87_v12  ;;  %v81_v17 = vadd.f32 %v80_v15, %v79_v13 }
  0xd6   :  { %114 = vpush %v81_v17  ;;  %v90_v18 = vrot.slane %v89_v16, 1 }
  0xd8   :  { %v91_v19 = vadd.f32 %v90_v18, %v89_v16 }
  0xda   :  { %116 = vpush %v91_v19 }
 0x107   :  { %s115_s2 = spop %114 }
 0x10b   :  { %s117_s19 = spop %116 }
 0x10c   :  { %v93_v20 = vstv %s117_s19 }
 0x10d   :  { %124 = vrcp.f32 %v93_v20 }
 0x117   :  { %v125_v21 = vpop.eup %124 }
 0x118   :  { %118 = vpush %v125_v21 }
 0x149   :  { %s119_s20 = spop %118 }
 0x14a   :  { %s96_s21 = smul.f32 %s119_s20, %s115_s2 }
 0x14c   :  { %98 = sst [smem:[#allocation10]] %s96_s21 }
 0x14d   :  { %201 = shalt.err (!%p198_p12)
}
 0x14e   :  { %s211_s29 = smov [#allocation10]  }
 0x14f   :  { %106 = dma.smem_to_hbm %s211_s29, 16, %s283_s3, [#allocation6]  }
 0x150   :  { %206 = dma.done.wait [#allocation6], 16  }
 0x151   :  { %207 = vsyncadd [#allocation6], 4294967280 }
 0x152   :  { %110 = sfence }
 0x153   :  { %111 = vsyncpa [#allocation5], 1 }
 0x154   :  { %112 = vsyncpa [#allocation8], 1 }
 0x155   :  { %113 = vsyncpa [#allocation6], 1 }

</bundles_post_ra>
